<compile_context>
chip_gen: v7x
topology: tpu7x:2x2x1
jax: 0.10.0
libtpu: 0.0.40
codegen_flags: <defaults>
</compile_context>

<pallas_src>
import jax
import jax.numpy as jnp
from jax import lax
from jax.experimental import pallas as pl
from jax.experimental.pallas import tpu as pltpu


def _round_up(n, m):
    return ((n + m - 1) // m) * m


def rnn_kernel(x_ref, h0_ref, wih_ref, whh_ref, b_ref, wout_ref, bout_ref,
               pred_ref, hT_ref, xproj_ref):
    """One batch-block of the RNN: batched input projection + serial recurrence.

    x_ref:     (T, BB, IP)  time-major, zero-padded input block
    h0_ref:    (BB, HP)     initial hidden state block
    wih_ref:   (IP, HP)     input->hidden weight (transposed vs torch, zero-padded)
    whh_ref:   (HP, HP)     hidden->hidden weight (transposed vs torch, zero-padded)
    b_ref:     (1, HP)      b_ih + b_hh (zero-padded)
    wout_ref:  (HP, OP)     final linear weight (transposed vs torch, zero-padded)
    bout_ref:  (1, OP)      final linear bias (zero-padded)
    pred_ref:  (BB, OP)     prediction block (lane-dense padded)
    hT_ref:    (BB, HP)     final hidden state block (aliases the h0 HBM buffer)
    xproj_ref: (T, BB, HP)  VMEM scratch holding the hoisted input projection
    """
    T, BB, IP = x_ref.shape
    HP = whh_ref.shape[0]

    # ---- Phase 1: hoisted input projection (one MXU matmul, bias folded in) ----
    x_all = x_ref[...].reshape(T * BB, IP)
    xproj = (jnp.dot(x_all, wih_ref[...], preferred_element_type=jnp.float32)
             + b_ref[...])                       # bias broadcast happens once
    xproj_ref[...] = xproj.reshape(T, BB, HP)

    whh = whh_ref[...]

    # ---- Phase 2: serial recurrence; only h @ whh is on the critical chain ----
    def step(t, h):
        pre = xproj_ref[t] + jnp.dot(h, whh, preferred_element_type=jnp.float32)
        return jnp.maximum(pre, 0.0)             # relu nonlinearity

    h = lax.fori_loop(0, T, step, h0_ref[...], unroll=True)

    # ---- Phase 3: final linear on the last hidden state ------------------------
    hT_ref[...] = h
    pred_ref[...] = (jnp.dot(h, wout_ref[...], preferred_element_type=jnp.float32)
                     + bout_ref[...])


def simple_rnn_forward(x, hidden, params):
    """x: (B, T, I) batch-first; hidden: (1, B, H).
    Returns (pred (B, O), hidden (1, B, H)) matching SimpleRNN.forward."""
    B, T, I = x.shape
    H = params["w_hh"].shape[0]
    O = params["w_out"].shape[1]

    # Pad to TPU tiles: sublane (8) on batch, lane (128) on feature dims.
    BB = 8                               # batch rows per grid program (sublane tile)
    BP = _round_up(max(B, BB), BB)
    IP = _round_up(I, 128)
    HP = _round_up(H, 128)
    OP = _round_up(O, 128)

    f32 = jnp.float32
    x_tm = jnp.transpose(x, (1, 0, 2)).astype(f32)                       # (T, B, I)
    x_p = jnp.zeros((T, BP, IP), f32).at[:, :B, :I].set(x_tm)
    h0_p = jnp.zeros((BP, HP), f32).at[:B, :H].set(hidden[0].astype(f32))
    wih_p = jnp.zeros((IP, HP), f32).at[:I, :H].set(params["w_ih"])
    whh_p = jnp.zeros((HP, HP), f32).at[:H, :H].set(params["w_hh"])
    b_p = jnp.zeros((1, HP), f32).at[0, :H].set(params["b_ih"] + params["b_hh"])
    wout_p = jnp.zeros((HP, OP), f32).at[:H, :O].set(params["w_out"])
    bout_p = jnp.zeros((1, OP), f32).at[0, :O].set(params["b_out"])

    grid = (BP // BB,)   # recurrence is serial in T but embarrassingly parallel in B

    pred_p, hT_p = pl.pallas_call(
        rnn_kernel,
        grid=grid,
        in_specs=[
            pl.BlockSpec((T, BB, IP), lambda i: (0, i, 0)),   # x (batch-blocked)
            pl.BlockSpec((BB, HP), lambda i: (i, 0)),         # h0 (batch-blocked)
            pl.BlockSpec((IP, HP), lambda i: (0, 0)),         # w_ih
            pl.BlockSpec((HP, HP), lambda i: (0, 0)),         # w_hh
            pl.BlockSpec((1, HP), lambda i: (0, 0)),          # b_ih + b_hh
            pl.BlockSpec((HP, OP), lambda i: (0, 0)),         # w_out
            pl.BlockSpec((1, OP), lambda i: (0, 0)),          # b_out
        ],
        out_specs=(
            pl.BlockSpec((BB, OP), lambda i: (i, 0)),         # pred (lane-dense)
            pl.BlockSpec((BB, HP), lambda i: (i, 0)),         # hT
        ),
        out_shape=(
            jax.ShapeDtypeStruct((BP, OP), f32),
            jax.ShapeDtypeStruct((BP, HP), f32),
        ),
        scratch_shapes=[pltpu.VMEM((T, BB, HP), f32)],        # hoisted x-projection
        input_output_aliases={1: 1},                          # h0 buffer reused for hT
        compiler_params=pltpu.CompilerParams(
            dimension_semantics=("parallel",),                # megacore-shardable on v7x
        ),
    )(x_p, h0_p, wih_p, whh_p, b_p, wout_p, bout_p)

    pred = pred_p[:B, :O]
    hT = hT_p[:B, :H]
    return pred, hT.reshape(1, B, H)


def init_params(key, input_size, hidden_size, output_size):
    """Deterministic init mimicking PyTorch's U(-1/sqrt(H), 1/sqrt(H))."""
    ks = jax.random.split(key, 6)
    bound = 1.0 / jnp.sqrt(hidden_size)
    return {
        # stored transposed relative to torch (so kernel does x @ W)
        "w_ih": jax.random.uniform(ks[0], (input_size, hidden_size), jnp.float32, -bound, bound),
        "w_hh": jax.random.uniform(ks[1], (hidden_size, hidden_size), jnp.float32, -bound, bound),
        "b_ih": jax.random.uniform(ks[2], (hidden_size,), jnp.float32, -bound, bound),
        "b_hh": jax.random.uniform(ks[3], (hidden_size,), jnp.float32, -bound, bound),
        "w_out": jax.random.uniform(ks[4], (hidden_size, output_size), jnp.float32, -bound, bound),
        "b_out": jax.random.uniform(ks[5], (output_size,), jnp.float32, -bound, bound),
    }


if __name__ == "__main__":
    B, T, I, H, O = 2, 8, 4, 32, 1

    key = jax.random.PRNGKey(0)
    k_params, k_x, k_h = jax.random.split(key, 3)

    params = init_params(k_params, I, H, O)
    x = jax.random.normal(k_x, (B, T, I), jnp.float32)          # batch-first, as in torch
    hidden = jax.random.normal(k_h, (1, B, H), jnp.float32)     # (num_layers, B, H)

    forward = jax.jit(simple_rnn_forward)
    pred, h_out = forward(x, hidden, params)
    jax.block_until_ready((pred, h_out))

    # lightweight sanity check against a pure-JAX reference of the same math
    def ref_forward(x, hidden, p):
        h = hidden[0]
        for t in range(x.shape[1]):
            h = jnp.maximum(x[:, t, :] @ p["w_ih"] + h @ p["w_hh"] + p["b_ih"] + p["b_hh"], 0.0)
        return h @ p["w_out"] + p["b_out"], h[None]

    pred_ref, h_ref = ref_forward(x, hidden, params)
    assert jnp.allclose(pred, pred_ref, atol=1e-5), "pred mismatch"
    assert jnp.allclose(h_out, h_ref, atol=1e-5), "hidden mismatch"

    print("KERNEL_OK")
</pallas_src>

<mosaic_0001>
module attributes {stable_mosaic.version = 11 : i64} {
  func.func @rnn_kernel(%arg0: i32, %arg1: memref<8x8x128xf32, #tpu.memory_space<vmem>>, %arg2: memref<8x128xf32, #tpu.memory_space<vmem>>, %arg3: memref<128x128xf32, #tpu.memory_space<vmem>>, %arg4: memref<128x128xf32, #tpu.memory_space<vmem>>, %arg5: memref<1x128xf32, #tpu.memory_space<vmem>>, %arg6: memref<128x128xf32, #tpu.memory_space<vmem>>, %arg7: memref<1x128xf32, #tpu.memory_space<vmem>>, %arg8: memref<8x128xf32, #tpu.memory_space<vmem>>, %arg9: memref<8x128xf32, #tpu.memory_space<vmem>>, %arg10: memref<8x8x128xf32, #tpu.memory_space<vmem>>) attributes {dimension_semantics = [#tpu.dimension_semantics<parallel>], iteration_bounds = array<i64: 1>, scalar_prefetch = 0 : i64, scratch_operands = 1 : i64, tpu.core_type = #tpu.core_type<tc>, window_params = [{transform_indices = @transform_0, window_bounds = array<i64: 8, 8, 128>}, {transform_indices = @transform_1, window_bounds = array<i64: 8, 128>}, {pipeline_mode = #tpu.pipeline_mode<synchronous>, transform_indices = @transform_2, window_bounds = array<i64: 128, 128>}, {pipeline_mode = #tpu.pipeline_mode<synchronous>, transform_indices = @transform_3, window_bounds = array<i64: 128, 128>}, {pipeline_mode = #tpu.pipeline_mode<synchronous>, transform_indices = @transform_4, window_bounds = array<i64: 1, 128>}, {pipeline_mode = #tpu.pipeline_mode<synchronous>, transform_indices = @transform_5, window_bounds = array<i64: 128, 128>}, {pipeline_mode = #tpu.pipeline_mode<synchronous>, transform_indices = @transform_6, window_bounds = array<i64: 1, 128>}, {transform_indices = @transform_7, window_bounds = array<i64: 8, 128>}, {transform_indices = @transform_8, window_bounds = array<i64: 8, 128>}]} {
    %c0 = arith.constant 0 : index
    %c0_0 = arith.constant 0 : index
    %c0_1 = arith.constant 0 : index
    %0 = vector.load %arg1[%c0, %c0_0, %c0_1] : memref<8x8x128xf32, #tpu.memory_space<vmem>>, vector<8x8x128xf32>
    %1 = vector.shape_cast %0 : vector<8x8x128xf32> to vector<64x128xf32>
    %c0_2 = arith.constant 0 : index
    %c0_3 = arith.constant 0 : index
    %2 = vector.load %arg3[%c0_2, %c0_3] : memref<128x128xf32, #tpu.memory_space<vmem>>, vector<128x128xf32>
    %cst = arith.constant dense<0.000000e+00> : vector<64x128xf32>
    %3 = tpu.matmul %1, %2, %cst {dimension_numbers = #tpu.dot_dimension_numbers<[1], [0], [0], [1], [0, 0, 1, 1], [], []>} : vector<64x128xf32>, vector<128x128xf32>, vector<64x128xf32> -> vector<64x128xf32>
    %c0_4 = arith.constant 0 : index
    %c0_5 = arith.constant 0 : index
    %4 = vector.load %arg5[%c0_4, %c0_5] : memref<1x128xf32, #tpu.memory_space<vmem>>, vector<1x128xf32>
    %5 = vector.broadcast %4 : vector<1x128xf32> to vector<64x128xf32>
    %6 = arith.addf %3, %5 : vector<64x128xf32>
    %7 = vector.shape_cast %6 : vector<64x128xf32> to vector<8x8x128xf32>
    %c0_6 = arith.constant 0 : index
    %c0_7 = arith.constant 0 : index
    %c0_8 = arith.constant 0 : index
    %8 = vector.load %arg10[%c0_6, %c0_7, %c0_8] : memref<8x8x128xf32, #tpu.memory_space<vmem>>, vector<8x8x128xf32>
    tpu.vector_store %arg10[%c0_6, %c0_7, %c0_8], %7 {strides = array<i32>} : memref<8x8x128xf32, #tpu.memory_space<vmem>>, vector<8x8x128xf32>,
    %c0_9 = arith.constant 0 : index
    %c0_10 = arith.constant 0 : index
    %9 = vector.load %arg4[%c0_9, %c0_10] : memref<128x128xf32, #tpu.memory_space<vmem>>, vector<128x128xf32>
    %c0_11 = arith.constant 0 : index
    %c0_12 = arith.constant 0 : index
    %10 = vector.load %arg2[%c0_11, %c0_12] : memref<8x128xf32, #tpu.memory_space<vmem>>, vector<8x128xf32>
    %c0_i32 = arith.constant 0 : i32
    %11 = arith.index_cast %c0_i32 : i32 to index
    %c0_13 = arith.constant 0 : index
    %c0_14 = arith.constant 0 : index
    %12 = vector.load %arg10[%11, %c0_13, %c0_14] : memref<8x8x128xf32, #tpu.memory_space<vmem>>, vector<1x8x128xf32>
    %13 = vector.shape_cast %12 : vector<1x8x128xf32> to vector<8x128xf32>
    %cst_15 = arith.constant dense<0.000000e+00> : vector<8x128xf32>
    %14 = tpu.matmul %10, %9, %cst_15 {dimension_numbers = #tpu.dot_dimension_numbers<[1], [0], [0], [1], [0, 0, 1, 1], [], []>} : vector<8x128xf32>, vector<128x128xf32>, vector<8x128xf32> -> vector<8x128xf32>
    %15 = arith.addf %13, %14 : vector<8x128xf32>
    %cst_16 = arith.constant 0.000000e+00 : f32
    %16 = vector.broadcast %cst_16 : f32 to vector<8x128xf32>
    %17 = arith.maximumf %15, %16 : vector<8x128xf32>
    %c1_i32 = arith.constant 1 : i32
    %18 = arith.index_cast %c1_i32 : i32 to index
    %c0_17 = arith.constant 0 : index
    %c0_18 = arith.constant 0 : index
    %19 = vector.load %arg10[%18, %c0_17, %c0_18] : memref<8x8x128xf32, #tpu.memory_space<vmem>>, vector<1x8x128xf32>
    %20 = vector.shape_cast %19 : vector<1x8x128xf32> to vector<8x128xf32>
    %cst_19 = arith.constant dense<0.000000e+00> : vector<8x128xf32>
    %21 = tpu.matmul %17, %9, %cst_19 {dimension_numbers = #tpu.dot_dimension_numbers<[1], [0], [0], [1], [0, 0, 1, 1], [], []>} : vector<8x128xf32>, vector<128x128xf32>, vector<8x128xf32> -> vector<8x128xf32>
    %22 = arith.addf %20, %21 : vector<8x128xf32>
    %cst_20 = arith.constant 0.000000e+00 : f32
    %23 = vector.broadcast %cst_20 : f32 to vector<8x128xf32>
    %24 = arith.maximumf %22, %23 : vector<8x128xf32>
    %c2_i32 = arith.constant 2 : i32
    %25 = arith.index_cast %c2_i32 : i32 to index
    %c0_21 = arith.constant 0 : index
    %c0_22 = arith.constant 0 : index
    %26 = vector.load %arg10[%25, %c0_21, %c0_22] : memref<8x8x128xf32, #tpu.memory_space<vmem>>, vector<1x8x128xf32>
    %27 = vector.shape_cast %26 : vector<1x8x128xf32> to vector<8x128xf32>
    %cst_23 = arith.constant dense<0.000000e+00> : vector<8x128xf32>
    %28 = tpu.matmul %24, %9, %cst_23 {dimension_numbers = #tpu.dot_dimension_numbers<[1], [0], [0], [1], [0, 0, 1, 1], [], []>} : vector<8x128xf32>, vector<128x128xf32>, vector<8x128xf32> -> vector<8x128xf32>
    %29 = arith.addf %27, %28 : vector<8x128xf32>
    %cst_24 = arith.constant 0.000000e+00 : f32
    %30 = vector.broadcast %cst_24 : f32 to vector<8x128xf32>
    %31 = arith.maximumf %29, %30 : vector<8x128xf32>
    %c3_i32 = arith.constant 3 : i32
    %32 = arith.index_cast %c3_i32 : i32 to index
    %c0_25 = arith.constant 0 : index
    %c0_26 = arith.constant 0 : index
    %33 = vector.load %arg10[%32, %c0_25, %c0_26] : memref<8x8x128xf32, #tpu.memory_space<vmem>>, vector<1x8x128xf32>
    %34 = vector.shape_cast %33 : vector<1x8x128xf32> to vector<8x128xf32>
    %cst_27 = arith.constant dense<0.000000e+00> : vector<8x128xf32>
    %35 = tpu.matmul %31, %9, %cst_27 {dimension_numbers = #tpu.dot_dimension_numbers<[1], [0], [0], [1], [0, 0, 1, 1], [], []>} : vector<8x128xf32>, vector<128x128xf32>, vector<8x128xf32> -> vector<8x128xf32>
    %36 = arith.addf %34, %35 : vector<8x128xf32>
    %cst_28 = arith.constant 0.000000e+00 : f32
    %37 = vector.broadcast %cst_28 : f32 to vector<8x128xf32>
    %38 = arith.maximumf %36, %37 : vector<8x128xf32>
    %c4_i32 = arith.constant 4 : i32
    %39 = arith.index_cast %c4_i32 : i32 to index
    %c0_29 = arith.constant 0 : index
    %c0_30 = arith.constant 0 : index
    %40 = vector.load %arg10[%39, %c0_29, %c0_30] : memref<8x8x128xf32, #tpu.memory_space<vmem>>, vector<1x8x128xf32>
    %41 = vector.shape_cast %40 : vector<1x8x128xf32> to vector<8x128xf32>
    %cst_31 = arith.constant dense<0.000000e+00> : vector<8x128xf32>
    %42 = tpu.matmul %38, %9, %cst_31 {dimension_numbers = #tpu.dot_dimension_numbers<[1], [0], [0], [1], [0, 0, 1, 1], [], []>} : vector<8x128xf32>, vector<128x128xf32>, vector<8x128xf32> -> vector<8x128xf32>
    %43 = arith.addf %41, %42 : vector<8x128xf32>
    %cst_32 = arith.constant 0.000000e+00 : f32
    %44 = vector.broadcast %cst_32 : f32 to vector<8x128xf32>
    %45 = arith.maximumf %43, %44 : vector<8x128xf32>
    %c5_i32 = arith.constant 5 : i32
    %46 = arith.index_cast %c5_i32 : i32 to index
    %c0_33 = arith.constant 0 : index
    %c0_34 = arith.constant 0 : index
    %47 = vector.load %arg10[%46, %c0_33, %c0_34] : memref<8x8x128xf32, #tpu.memory_space<vmem>>, vector<1x8x128xf32>
    %48 = vector.shape_cast %47 : vector<1x8x128xf32> to vector<8x128xf32>
    %cst_35 = arith.constant dense<0.000000e+00> : vector<8x128xf32>
    %49 = tpu.matmul %45, %9, %cst_35 {dimension_numbers = #tpu.dot_dimension_numbers<[1], [0], [0], [1], [0, 0, 1, 1], [], []>} : vector<8x128xf32>, vector<128x128xf32>, vector<8x128xf32> -> vector<8x128xf32>
    %50 = arith.addf %48, %49 : vector<8x128xf32>
    %cst_36 = arith.constant 0.000000e+00 : f32
    %51 = vector.broadcast %cst_36 : f32 to vector<8x128xf32>
    %52 = arith.maximumf %50, %51 : vector<8x128xf32>
    %c6_i32 = arith.constant 6 : i32
    %53 = arith.index_cast %c6_i32 : i32 to index
    %c0_37 = arith.constant 0 : index
    %c0_38 = arith.constant 0 : index
    %54 = vector.load %arg10[%53, %c0_37, %c0_38] : memref<8x8x128xf32, #tpu.memory_space<vmem>>, vector<1x8x128xf32>
    %55 = vector.shape_cast %54 : vector<1x8x128xf32> to vector<8x128xf32>
    %cst_39 = arith.constant dense<0.000000e+00> : vector<8x128xf32>
    %56 = tpu.matmul %52, %9, %cst_39 {dimension_numbers = #tpu.dot_dimension_numbers<[1], [0], [0], [1], [0, 0, 1, 1], [], []>} : vector<8x128xf32>, vector<128x128xf32>, vector<8x128xf32> -> vector<8x128xf32>
    %57 = arith.addf %55, %56 : vector<8x128xf32>
    %cst_40 = arith.constant 0.000000e+00 : f32
    %58 = vector.broadcast %cst_40 : f32 to vector<8x128xf32>
    %59 = arith.maximumf %57, %58 : vector<8x128xf32>
    %c7_i32 = arith.constant 7 : i32
    %60 = arith.index_cast %c7_i32 : i32 to index
    %c0_41 = arith.constant 0 : index
    %c0_42 = arith.constant 0 : index
    %61 = vector.load %arg10[%60, %c0_41, %c0_42] : memref<8x8x128xf32, #tpu.memory_space<vmem>>, vector<1x8x128xf32>
    %62 = vector.shape_cast %61 : vector<1x8x128xf32> to vector<8x128xf32>
    %cst_43 = arith.constant dense<0.000000e+00> : vector<8x128xf32>
    %63 = tpu.matmul %59, %9, %cst_43 {dimension_numbers = #tpu.dot_dimension_numbers<[1], [0], [0], [1], [0, 0, 1, 1], [], []>} : vector<8x128xf32>, vector<128x128xf32>, vector<8x128xf32> -> vector<8x128xf32>
    %64 = arith.addf %62, %63 : vector<8x128xf32>
    %cst_44 = arith.constant 0.000000e+00 : f32
    %65 = vector.broadcast %cst_44 : f32 to vector<8x128xf32>
    %66 = arith.maximumf %64, %65 : vector<8x128xf32>
    %c8_i32 = arith.constant 8 : i32
    %c0_45 = arith.constant 0 : index
    %c0_46 = arith.constant 0 : index
    %67 = vector.load %arg9[%c0_45, %c0_46] : memref<8x128xf32, #tpu.memory_space<vmem>>, vector<8x128xf32>
    tpu.vector_store %arg9[%c0_45, %c0_46], %66 {strides = array<i32>} : memref<8x128xf32, #tpu.memory_space<vmem>>, vector<8x128xf32>,
    %c0_47 = arith.constant 0 : index
    %c0_48 = arith.constant 0 : index
    %68 = vector.load %arg6[%c0_47, %c0_48] : memref<128x128xf32, #tpu.memory_space<vmem>>, vector<128x128xf32>
    %cst_49 = arith.constant dense<0.000000e+00> : vector<8x128xf32>
    %69 = tpu.matmul %66, %68, %cst_49 {dimension_numbers = #tpu.dot_dimension_numbers<[1], [0], [0], [1], [0, 0, 1, 1], [], []>} : vector<8x128xf32>, vector<128x128xf32>, vector<8x128xf32> -> vector<8x128xf32>
    %c0_50 = arith.constant 0 : index
    %c0_51 = arith.constant 0 : index
    %70 = vector.load %arg7[%c0_50, %c0_51] : memref<1x128xf32, #tpu.memory_space<vmem>>, vector<1x128xf32>
    %71 = vector.broadcast %70 : vector<1x128xf32> to vector<8x128xf32>
    %72 = arith.addf %69, %71 : vector<8x128xf32>
    %c0_52 = arith.constant 0 : index
    %c0_53 = arith.constant 0 : index
    %73 = vector.load %arg8[%c0_52, %c0_53] : memref<8x128xf32, #tpu.memory_space<vmem>>, vector<8x128xf32>
    tpu.vector_store %arg8[%c0_52, %c0_53], %72 {strides = array<i32>} : memref<8x128xf32, #tpu.memory_space<vmem>>, vector<8x128xf32>,
    return
  }
  func.func @transform_0(%arg0: i32) -> (i32, i32, i32) {
    %c0_i32 = arith.constant 0 : i32
    %c0_i32_0 = arith.constant 0 : i32
    %c0_i32_1 = arith.constant 0 : i32
    return %c0_i32, %arg0, %c0_i32_0 : i32, i32, i32
  }
  func.func @transform_1(%arg0: i32) -> (i32, i32) {
    %c0_i32 = arith.constant 0 : i32
    %c0_i32_0 = arith.constant 0 : i32
    return %arg0, %c0_i32 : i32, i32
  }
  func.func @transform_2(%arg0: i32) -> (i32, i32) {
    %c0_i32 = arith.constant 0 : i32
    %c0_i32_0 = arith.constant 0 : i32
    %c0_i32_1 = arith.constant 0 : i32
    return %c0_i32, %c0_i32_0 : i32, i32
  }
  func.func @transform_3(%arg0: i32) -> (i32, i32) {
    %c0_i32 = arith.constant 0 : i32
    %c0_i32_0 = arith.constant 0 : i32
    %c0_i32_1 = arith.constant 0 : i32
    return %c0_i32, %c0_i32_0 : i32, i32
  }
  func.func @transform_4(%arg0: i32) -> (i32, i32) {
    %c0_i32 = arith.constant 0 : i32
    %c0_i32_0 = arith.constant 0 : i32
    %c0_i32_1 = arith.constant 0 : i32
    return %c0_i32, %c0_i32_0 : i32, i32
  }
  func.func @transform_5(%arg0: i32) -> (i32, i32) {
    %c0_i32 = arith.constant 0 : i32
    %c0_i32_0 = arith.constant 0 : i32
    %c0_i32_1 = arith.constant 0 : i32
    return %c0_i32, %c0_i32_0 : i32, i32
  }
  func.func @transform_6(%arg0: i32) -> (i32, i32) {
    %c0_i32 = arith.constant 0 : i32
    %c0_i32_0 = arith.constant 0 : i32
    %c0_i32_1 = arith.constant 0 : i32
    return %c0_i32, %c0_i32_0 : i32, i32
  }
  func.func @transform_7(%arg0: i32) -> (i32, i32) {
    %c0_i32 = arith.constant 0 : i32
    %c0_i32_0 = arith.constant 0 : i32
    return %arg0, %c0_i32 : i32, i32
  }
  func.func @transform_8(%arg0: i32) -> (i32, i32) {
    %c0_i32 = arith.constant 0 : i32
    %c0_i32_0 = arith.constant 0 : i32
    return %arg0, %c0_i32 : i32, i32
  }
}

</mosaic_0001>

<bundles_post_ra>
// kernel: simple_rnn_forward.1
= control target key start
LH: loop header
LB: loop body
LE: loop exit
PB: predicated region body
PF: predicated region fallthrough
CT: control target
= control target key end

     0   :  { %v1672_v2 = vmov 0.0|0.0   ;;  %vm1673_vm0 = vmmov 0   ;;  %v1674_v4 = vmov 0.0   ;;  %s2098_s2 = inlined_call_operand.vmem [shape: f32[128,128], index: 2, kind: input, shape index: {}]   ;;  %s2099_s3 = inlined_call_operand.vmem [shape: f32[128,128], index: 3, kind: input, shape index: {}]   ;;  %s2100_s0 = inlined_call_operand.vmem [shape: f32[8,8,128], index: 0, kind: input, shape index: {}]   ;;  %s2101_s1 = inlined_call_operand.vmem [shape: f32[8,128], index: 1, kind: input, shape index: {}, may-alias: {1,8}]   ;;  %s2102_s4 = inlined_call_operand.vmem [shape: f32[1,128], index: 4, kind: input, shape index: {}]   ;;  %s2103_s5 = inlined_call_operand.vmem [shape: f32[128,128], index: 5, kind: input, shape index: {}]   ;;  %s2104_s8 = inlined_call_operand.vmem [shape: f32[8,128], index: 8, kind: output, shape index: {1}, may-alias: {1,8}]   ;;  %s2105_s6 = inlined_call_operand.vmem [shape: f32[1,128], index: 6, kind: input, shape index: {}]   ;;  %s2106_s7 = inlined_call_operand.vmem [shape: f32[8,128], index: 7, kind: output, shape index: {0}]  }
   0x1   :  { %v36_v0 = vld [vmem:[%s2098_s2] sm:$0xff]  ;;  %v37_v1 = vld [vmem:[%s2098_s2 + $0x8] sm:$0xff]  ;;  %1453 = vmatprep.subr.bf16.mxu1 %v1672_v2  ;;  %1138 = vmatprep.mubr.msk.f32.mxu1 %vm1673_vm0, %v1674_v4  ;;  %v38_v7 = vld [vmem:[%s2098_s2 + $0x10] sm:$0xff] }
   0x2   :  { %v172_v3 = vld [vmem:[%s2099_s3] sm:$0xff]  ;;  %v1421_v5 = vpack.c.bf16 %v37_v1, %v36_v0  ;;  %v173_v6 = vld [vmem:[%s2099_s3 + $0x8] sm:$0xff]  ;;  %v39_v8 = vld [vmem:[%s2098_s2 + $0x18] sm:$0xff] }
   0x3   :  { %v1741_v9 = vpack.c.bf16 %v173_v6, %v172_v3  ;;  %v1425_v10 = vpack.c.bf16 %v39_v8, %v38_v7  ;;  %v174_v11 = vld [vmem:[%s2099_s3 + $0x10] sm:$0xff]  ;;  %v175_v12 = vld [vmem:[%s2099_s3 + $0x18] sm:$0xff]  ;;  %v40_v13 = vld [vmem:[%s2098_s2 + $0x20] sm:$0xff] }
   0x4   :  { %1422 = vmatprep.subr.bf16.mxu0 %v1421_v5  ;;  %v41_v14 = vld [vmem:[%s2098_s2 + $0x28] sm:$0xff]  ;;  %v1756_v15 = vpack.c.bf16 %v175_v12, %v174_v11  ;;  %v176_v17 = vld [vmem:[%s2099_s3 + $0x20] sm:$0xff]  ;;  %v42_v19 = vld [vmem:[%s2098_s2 + $0x30] sm:$0xff] }
   0x5   :  { %1424 = vmatpush3.bf16.msra.mxu0 %v1421_v5  ;;  %1455 = vmatpush3.bf16.msra.mxu1 %v1741_v9  ;;  %v1429_v16 = vpack.c.bf16 %v41_v14, %v40_v13  ;;  %v177_v18 = vld [vmem:[%s2099_s3 + $0x28] sm:$0xff]  ;;  %v43_v20 = vld [vmem:[%s2098_s2 + $0x38] sm:$0xff]  ;;  %v178_v23 = vld [vmem:[%s2099_s3 + $0x30] sm:$0xff] }
   0x6   :  { %1426 = vmatprep.subr.bf16.mxu0 %v1425_v10  ;;  %1456 = vmatprep.subr.bf16.mxu1 %v1672_v2  ;;  %v1772_v21 = vpack.c.bf16 %v177_v18, %v176_v17  ;;  %v1433_v22 = vpack.c.bf16 %v43_v20, %v42_v19  ;;  %v179_v24 = vld [vmem:[%s2099_s3 + $0x38] sm:$0xff]  ;;  %v44_v25 = vld [vmem:[%s2098_s2 + $0x40] sm:$0xff]  ;;  %v45_v26 = vld [vmem:[%s2098_s2 + $0x48] sm:$0xff] }
   0x7   :  { %v28_v27 = vld [vmem:[%s2100_s0] sm:$0xff]  ;;  %v1791_v28 = vpack.c.bf16 %v179_v24, %v178_v23  ;;  %v1437_v29 = vpack.c.bf16 %v45_v26, %v44_v25  ;;  %v181_v31 = vld [vmem:[%s2099_s3 + $0x48] sm:$0xff]  ;;  %v46_v32 = vld [vmem:[%s2098_s2 + $0x50] sm:$0xff] }
   0x8   :  { %1094 = vmatprep.mubr.f32.mxu0 %v28_v27  ;;  %v180_v30 = vld [vmem:[%s2099_s3 + $0x40] sm:$0xff]  ;;  %v47_v33 = vld [vmem:[%s2098_s2 + $0x58] sm:$0xff]  ;;  %v182_v36 = vld [vmem:[%s2099_s3 + $0x50] sm:$0xff] }
   0x9   :  { %1428 = vmatpush3.bf16.msra.mxu0 %v1425_v10  ;;  %1458 = vmatpush3.bf16.msra.mxu1 %v1756_v15  ;;  %v1807_v34 = vpack.c.bf16 %v181_v31, %v180_v30  ;;  %v1441_v35 = vpack.c.bf16 %v47_v33, %v46_v32  ;;  %v183_v37 = vld [vmem:[%s2099_s3 + $0x58] sm:$0xff]  ;;  %v48_v38 = vld [vmem:[%s2098_s2 + $0x60] sm:$0xff]  ;;  %v49_v39 = vld [vmem:[%s2098_s2 + $0x68] sm:$0xff] }
   0xa   :  { %1430 = vmatprep.subr.bf16.mxu0 %v1429_v16  ;;  %1459 = vmatprep.subr.bf16.mxu1 %v1672_v2  ;;  %v1823_v40 = vpack.c.bf16 %v183_v37, %v182_v36  ;;  %v1445_v41 = vpack.c.bf16 %v49_v39, %v48_v38  ;;  %v184_v42 = vld [vmem:[%s2099_s3 + $0x60] sm:$0xff]  ;;  %v185_v43 = vld [vmem:[%s2099_s3 + $0x68] sm:$0xff]  ;;  %v50_v44 = vld [vmem:[%s2098_s2 + $0x70] sm:$0xff] }
   0xb   :  { %v51_v45 = vld [vmem:[%s2098_s2 + $0x78] sm:$0xff]  ;;  %v1839_v46 = vpack.c.bf16 %v185_v43, %v184_v42  ;;  %v186_v48 = vld [vmem:[%s2099_s3 + $0x70] sm:$0xff]  ;;  %v29_v51 = vld [vmem:[%s2100_s0 + $0x8] sm:$0xff] }
   0xc   :  { %v1449_v47 = vpack.c.bf16 %v51_v45, %v50_v44  ;;  %v187_v49 = vld [vmem:[%s2099_s3 + $0x78] sm:$0xff]  ;;  %v188_v52 = vld [vmem:[%s2101_s1] sm:$0xff]  ;;  %v30_v53 = vld [vmem:[%s2100_s0 + $0x10] sm:$0xff] }
   0xd   :  { %1432 = vmatpush3.bf16.msra.mxu0 %v1429_v16  ;;  %1461 = vmatpush3.bf16.msra.mxu1 %v1772_v21  ;;  %v1849_v50 = vpack.c.bf16 %v187_v49, %v186_v48  ;;  %v31_v54 = vld [vmem:[%s2100_s0 + $0x18] sm:$0xff]  ;;  %v32_v55 = vld [vmem:[%s2100_s0 + $0x20] sm:$0xff]  ;;  %v33_v56 = vld [vmem:[%s2100_s0 + $0x28] sm:$0xff] }
   0xe   :  { %1434 = vmatprep.subr.bf16.mxu0 %v1433_v22  ;;  %1462 = vmatprep.subr.bf16.mxu1 %v1672_v2  ;;  %v34_v57 = vld [vmem:[%s2100_s0 + $0x30] sm:$0xff]  ;;  %v35_v58 = vld [vmem:[%s2100_s0 + $0x38] sm:$0xff]  ;;  %v1918_v59 = vld [vmem:[%s2102_s4] ss:$0 sm:$0xff] }
   0xf   :  { %v782_v37 = vld [vmem:[%s2103_s5 + $0x8] sm:$0xff]  ;;  %v783_v38 = vld [vmem:[%s2103_s5 + $0x10] sm:$0xff]  ;;  %v788_v45 = vld [vmem:[%s2103_s5 + $0x38] sm:$0xff] }
  0x10   :  { %v786_v42 = vld [vmem:[%s2103_s5 + $0x28] sm:$0xff]  ;;  %v787_v44 = vld [vmem:[%s2103_s5 + $0x30] sm:$0xff] }
  0x11   :  { %1436 = vmatpush3.bf16.msra.mxu0 %v1433_v22  ;;  %1464 = vmatpush3.bf16.msra.mxu1 %v1791_v28  ;;  %v790_v48 = vld [vmem:[%s2103_s5 + $0x48] sm:$0xff] }
  0x12   :  { %1438 = vmatprep.subr.bf16.mxu0 %v1437_v29  ;;  %1465 = vmatprep.subr.bf16.mxu1 %v1672_v2 }
  0x15   :  { %1440 = vmatpush3.bf16.msra.mxu0 %v1437_v29  ;;  %1467 = vmatpush3.bf16.msra.mxu1 %v1807_v34 }
  0x16   :  { %1442 = vmatprep.subr.bf16.mxu0 %v1441_v35  ;;  %1468 = vmatprep.subr.bf16.mxu1 %v1672_v2 }
  0x19   :  { %1444 = vmatpush3.bf16.msra.mxu0 %v1441_v35  ;;  %1470 = vmatpush3.bf16.msra.mxu1 %v1823_v40 }
  0x1a   :  { %1446 = vmatprep.subr.bf16.mxu0 %v1445_v41  ;;  %1471 = vmatprep.subr.bf16.mxu1 %v1672_v2 }
  0x1d   :  { %1448 = vmatpush3.bf16.msra.mxu0 %v1445_v41  ;;  %1473 = vmatpush3.bf16.msra.mxu1 %v1839_v46 }
  0x1e   :  { %1450 = vmatprep.subr.bf16.mxu0 %v1449_v47  ;;  %1474 = vmatprep.subr.bf16.mxu1 %v1672_v2 }
  0x21   :  { %1452 = vmatpush3.bf16.msra.mxu0 %v1449_v47  ;;  %1476 = vmatpush3.bf16.msra.mxu1 %v1849_v50  ;;  %v789_v47 = vld [vmem:[%s2103_s5 + $0x40] sm:$0xff] }
  0x22   :  { %1477 = vmatprep.subr.bf16.mxu0 %v1672_v2  ;;  %1501 = vmatprep.subr.bf16.mxu1 %v1672_v2  ;;  %v1658_v49 = vpack.c.bf16 %v790_v48, %v789_v47 }
  0x24   :  { %1095 = vmatmul.mubr.f32.vlgmr.msra.gmra.mrb[0].mxu0 %v29_v51  ;;  %1139 = vmatmul.mubr.f32.vlgmr.msra.gmra.mrb[0].mxu1 %v188_v52  ;;  %v792_v51 = vld [vmem:[%s2103_s5 + $0x58] sm:$0xff] }
  0x25   :  { %1479 = vmatpush3.bf16.msra.mxu0 %v1741_v9  ;;  %1097 = vmatprep.mubr.f32.mxu0 %v30_v53  ;;  %v793_v53 = vld [vmem:[%s2103_s5 + $0x60] sm:$0xff] }
  0x26   :  { %1480 = vmatprep.subr.bf16.mxu0 %v1672_v2  ;;  %1503 = vmatpush3.bf16.msra.mxu1 %v1741_v9 }
  0x27   :  { %1504 = vmatprep.subr.bf16.mxu1 %v1672_v2  ;;  %1208 = vmatprep.mubr.msk.f32.mxu1 %vm1673_vm0, %v1674_v4 }
  0x28   :  { %1098 = vmatmul.mubr.f32.gmra.mrb[2].mxu0 %v31_v54  ;;  %v794_v54 = vld [vmem:[%s2103_s5 + $0x68] sm:$0xff] }
  0x29   :  { %1482 = vmatpush3.bf16.msra.mxu0 %v1756_v15  ;;  %1100 = vmatprep.mubr.f32.mxu0 %v32_v55  ;;  %v1664_v55 = vpack.c.bf16 %v794_v54, %v793_v53 }
  0x2a   :  { %1483 = vmatprep.subr.bf16.mxu0 %v1672_v2  ;;  %1506 = vmatpush3.bf16.msra.mxu1 %v1756_v15 }
  0x2b   :  { %1507 = vmatprep.subr.bf16.mxu1 %v1672_v2 }
  0x2c   :  { %1101 = vmatmul.mubr.f32.gmra.mrb[4].mxu0 %v33_v56 }
  0x2d   :  { %1485 = vmatpush3.bf16.msra.mxu0 %v1772_v21  ;;  %1103 = vmatprep.mubr.f32.mxu0 %v34_v57 }
  0x2e   :  { %1486 = vmatprep.subr.bf16.mxu0 %v1672_v2  ;;  %1509 = vmatpush3.bf16.msra.mxu1 %v1772_v21 }
  0x2f   :  { %1510 = vmatprep.subr.bf16.mxu1 %v1672_v2 }
  0x30   :  { %1104 = vmatmul.mubr.f32.gmra.mrb[6].mxu0 %v35_v58 }
  0x31   :  { %1488 = vmatpush3.bf16.msra.mxu0 %v1791_v28  ;;  %1173 = vmatprep.mubr.msk.f32.mxu0 %vm1673_vm0, %v1674_v4 }
  0x32   :  { %1489 = vmatprep.subr.bf16.mxu0 %v1672_v2  ;;  %1512 = vmatpush3.bf16.msra.mxu1 %v1791_v28 }
  0x33   :  { %1513 = vmatprep.subr.bf16.mxu1 %v1672_v2 }
  0x35   :  { %1491 = vmatpush3.bf16.msra.mxu0 %v1807_v34 }
  0x36   :  { %1492 = vmatprep.subr.bf16.mxu0 %v1672_v2  ;;  %1515 = vmatpush3.bf16.msra.mxu1 %v1807_v34 }
  0x37   :  { %1516 = vmatprep.subr.bf16.mxu1 %v1672_v2 }
  0x39   :  { %1494 = vmatpush3.bf16.msra.mxu0 %v1823_v40 }
  0x3a   :  { %1495 = vmatprep.subr.bf16.mxu0 %v1672_v2  ;;  %1518 = vmatpush3.bf16.msra.mxu1 %v1823_v40 }
  0x3b   :  { %1519 = vmatprep.subr.bf16.mxu1 %v1672_v2 }
  0x3d   :  { %1497 = vmatpush3.bf16.msra.mxu0 %v1839_v46 }
  0x3e   :  { %1498 = vmatprep.subr.bf16.mxu0 %v1672_v2  ;;  %1521 = vmatpush3.bf16.msra.mxu1 %v1839_v46 }
  0x3f   :  { %1522 = vmatprep.subr.bf16.mxu1 %v1672_v2 }
  0x41   :  { %1500 = vmatpush3.bf16.msra.mxu0 %v1849_v50 }
  0x42   :  { %1524 = vmatpush3.bf16.msra.mxu1 %v1849_v50  ;;  %1525 = vmatprep.subr.bf16.mxu0 %v1672_v2 }
  0x43   :  { %1549 = vmatprep.subr.bf16.mxu1 %v1672_v2 }
  0xf7   :  { %v1096_v60 = vpop.f32.mrb[0].mxu0  ;;  %v256_v61 = vpop.f32.mrb[0].mxu1 }
  0xf8   :  { %v125_v62 = vpop.f32.mrb[1].mxu0  ;;  %v1140_v63 = vpop.f32.mrb[1].mxu1  ;;  %v131_v12 = vadd.f32 %v1096_v60, %v1918_v59 }
  0xf9   :  { %v126_v0 = vadd.f32 %v1918_v59, %v125_v62  ;;  %v795_v62 = vld [vmem:[%s2103_s5 + $0x70] sm:$0xff]  ;;  %v796_v63 = vld [vmem:[%s2103_s5 + $0x78] sm:$0xff] }
  0xfb   :  { %v260_v1 = vadd.f32 %v256_v61, %v126_v0  ;;  %v1921_v3 = vpop.f32.mrb[2].mxu0  ;;  %v1667_v0 = vpack.c.bf16 %v796_v63, %v795_v62 }
  0xfc   :  { %v135_v5 = vpop.f32.mrb[3].mxu0  ;;  %v141_v24 = vadd.f32 %v1921_v3, %v1918_v59 }
  0xfd   :  { %v261_v6 = vmax.f32 %v260_v1, 0.0  ;;  %v136_v18 = vadd.f32 %v1918_v59, %v135_v5 }
  0xff   :  { %1174 = vmatmul.mubr.f32.vlgmr.msra.gmra.mrb[8].mxu0 %v261_v6  ;;  %v1923_v7 = vpop.f32.mrb[4].mxu0 }
 0x100   :  { %v1925_v8 = vpop.f32.mrb[5].mxu0  ;;  %1527 = vmatpush3.bf16.msra.mxu0 %v1741_v9  ;;  %1243 = vmatprep.mubr.msk.f32.mxu0 %vm1673_vm0, %v1674_v4 }
 0x101   :  { %1528 = vmatprep.subr.bf16.mxu0 %v1672_v2  ;;  %v146_v30 = vadd.f32 %v1918_v59, %v1925_v8 }
 0x103   :  { %v1945_v10 = vpop.f32.mrb[6].mxu0 }
 0x104   :  { %1530 = vmatpush3.bf16.msra.mxu0 %v1756_v15  ;;  %v1947_v11 = vpop.f32.mrb[7].mxu0 }
 0x105   :  { %1531 = vmatprep.subr.bf16.mxu0 %v1672_v2  ;;  %v156_v56 = vadd.f32 %v1918_v59, %v1947_v11 }
 0x108   :  { %1533 = vmatpush3.bf16.msra.mxu0 %v1772_v21 }
 0x109   :  { %1534 = vmatprep.subr.bf16.mxu0 %v1672_v2 }
 0x10c   :  { %1536 = vmatpush3.bf16.msra.mxu0 %v1791_v28 }
 0x10d   :  { %1537 = vmatprep.subr.bf16.mxu0 %v1672_v2 }
 0x110   :  { %1539 = vmatpush3.bf16.msra.mxu0 %v1807_v34 }
 0x111   :  { %1540 = vmatprep.subr.bf16.mxu0 %v1672_v2 }
 0x114   :  { %1542 = vmatpush3.bf16.msra.mxu0 %v1823_v40 }
 0x115   :  { %1543 = vmatprep.subr.bf16.mxu0 %v1672_v2 }
 0x118   :  { %1545 = vmatpush3.bf16.msra.mxu0 %v1839_v46 }
 0x119   :  { %1546 = vmatprep.subr.bf16.mxu0 %v1672_v2 }
 0x11c   :  { %1548 = vmatpush3.bf16.msra.mxu0 %v1849_v50 }
 0x11d   :  { %1573 = vmatprep.subr.bf16.mxu0 %v1672_v2 }
 0x1d2   :  { %v330_v13 = vpop.f32.mrb[8].mxu0 }
 0x1d3   :  { %v334_v14 = vadd.f32 %v330_v13, %v131_v12  ;;  %v1175_v16 = vpop.f32.mrb[9].mxu0 }
 0x1d5   :  { %v335_v17 = vmax.f32 %v334_v14, 0.0 }
 0x1d7   :  { %1209 = vmatmul.mubr.f32.vlgmr.msra.gmra.mrb[2].mxu1 %v335_v17 }
 0x1d8   :  { %1551 = vmatpush3.bf16.msra.mxu1 %v1741_v9  ;;  %1278 = vmatprep.mubr.msk.f32.mxu1 %vm1673_vm0, %v1674_v4 }
 0x1d9   :  { %1552 = vmatprep.subr.bf16.mxu1 %v1672_v2 }
 0x1dc   :  { %1554 = vmatpush3.bf16.msra.mxu1 %v1756_v15 }
 0x1dd   :  { %1555 = vmatprep.subr.bf16.mxu1 %v1672_v2 }
 0x1e0   :  { %1557 = vmatpush3.bf16.msra.mxu1 %v1772_v21 }
 0x1e1   :  { %1558 = vmatprep.subr.bf16.mxu1 %v1672_v2 }
 0x1e4   :  { %1560 = vmatpush3.bf16.msra.mxu1 %v1791_v28 }
 0x1e5   :  { %1561 = vmatprep.subr.bf16.mxu1 %v1672_v2 }
 0x1e8   :  { %1563 = vmatpush3.bf16.msra.mxu1 %v1807_v34 }
 0x1e9   :  { %1564 = vmatprep.subr.bf16.mxu1 %v1672_v2 }
 0x1ec   :  { %1566 = vmatpush3.bf16.msra.mxu1 %v1823_v40 }
 0x1ed   :  { %1567 = vmatprep.subr.bf16.mxu1 %v1672_v2 }
 0x1f0   :  { %1569 = vmatpush3.bf16.msra.mxu1 %v1839_v46 }
 0x1f1   :  { %1570 = vmatprep.subr.bf16.mxu1 %v1672_v2 }
 0x1f4   :  { %1572 = vmatpush3.bf16.msra.mxu1 %v1849_v50 }
 0x1f5   :  { %1597 = vmatprep.subr.bf16.mxu1 %v1672_v2 }
 0x2aa   :  { %v404_v19 = vpop.f32.mrb[2].mxu1 }
 0x2ab   :  { %v408_v20 = vadd.f32 %v404_v19, %v136_v18  ;;  %v1210_v22 = vpop.f32.mrb[3].mxu1 }
 0x2ad   :  { %v409_v23 = vmax.f32 %v408_v20, 0.0 }
 0x2af   :  { %1244 = vmatmul.mubr.f32.vlgmr.msra.gmra.mrb[10].mxu0 %v409_v23 }
 0x2b0   :  { %1575 = vmatpush3.bf16.msra.mxu0 %v1741_v9  ;;  %1313 = vmatprep.mubr.msk.f32.mxu0 %vm1673_vm0, %v1674_v4 }
 0x2b1   :  { %1576 = vmatprep.subr.bf16.mxu0 %v1672_v2 }
 0x2b4   :  { %1578 = vmatpush3.bf16.msra.mxu0 %v1756_v15 }
 0x2b5   :  { %1579 = vmatprep.subr.bf16.mxu0 %v1672_v2 }
 0x2b8   :  { %1581 = vmatpush3.bf16.msra.mxu0 %v1772_v21 }
 0x2b9   :  { %1582 = vmatprep.subr.bf16.mxu0 %v1672_v2 }
 0x2bc   :  { %1584 = vmatpush3.bf16.msra.mxu0 %v1791_v28 }
 0x2bd   :  { %1585 = vmatprep.subr.bf16.mxu0 %v1672_v2 }
 0x2c0   :  { %1587 = vmatpush3.bf16.msra.mxu0 %v1807_v34 }
 0x2c1   :  { %1588 = vmatprep.subr.bf16.mxu0 %v1672_v2 }
 0x2c4   :  { %1590 = vmatpush3.bf16.msra.mxu0 %v1823_v40 }
 0x2c5   :  { %1591 = vmatprep.subr.bf16.mxu0 %v1672_v2 }
 0x2c8   :  { %1593 = vmatpush3.bf16.msra.mxu0 %v1839_v46 }
 0x2c9   :  { %1594 = vmatprep.subr.bf16.mxu0 %v1672_v2 }
 0x2cc   :  { %1596 = vmatpush3.bf16.msra.mxu0 %v1849_v50 }
 0x2cd   :  { %1621 = vmatprep.subr.bf16.mxu0 %v1672_v2 }
 0x382   :  { %v478_v25 = vpop.f32.mrb[10].mxu0 }
 0x383   :  { %v482_v26 = vadd.f32 %v478_v25, %v141_v24  ;;  %v1245_v27 = vpop.f32.mrb[11].mxu0 }
 0x385   :  { %v483_v29 = vmax.f32 %v482_v26, 0.0 }
 0x387   :  { %1279 = vmatmul.mubr.f32.vlgmr.msra.gmra.mrb[4].mxu1 %v483_v29 }
 0x388   :  { %1599 = vmatpush3.bf16.msra.mxu1 %v1741_v9  ;;  %1348 = vmatprep.mubr.msk.f32.mxu1 %vm1673_vm0, %v1674_v4 }
 0x389   :  { %1600 = vmatprep.subr.bf16.mxu1 %v1672_v2 }
 0x38c   :  { %1602 = vmatpush3.bf16.msra.mxu1 %v1756_v15 }
 0x38d   :  { %1603 = vmatprep.subr.bf16.mxu1 %v1672_v2 }
 0x390   :  { %1605 = vmatpush3.bf16.msra.mxu1 %v1772_v21 }
 0x391   :  { %1606 = vmatprep.subr.bf16.mxu1 %v1672_v2 }
 0x394   :  { %1608 = vmatpush3.bf16.msra.mxu1 %v1791_v28 }
 0x395   :  { %1609 = vmatprep.subr.bf16.mxu1 %v1672_v2 }
 0x398   :  { %1611 = vmatpush3.bf16.msra.mxu1 %v1807_v34 }
 0x399   :  { %1612 = vmatprep.subr.bf16.mxu1 %v1672_v2 }
 0x39c   :  { %1614 = vmatpush3.bf16.msra.mxu1 %v1823_v40 }
 0x39d   :  { %1615 = vmatprep.subr.bf16.mxu1 %v1672_v2 }
 0x3a0   :  { %1617 = vmatpush3.bf16.msra.mxu1 %v1839_v46 }
 0x3a1   :  { %1618 = vmatprep.subr.bf16.mxu1 %v1672_v2 }
 0x3a4   :  { %1620 = vmatpush3.bf16.msra.mxu1 %v1849_v50 }
 0x3a5   :  { %1645 = vmatprep.subr.bf16.mxu1 %v1672_v2 }
 0x45a   :  { %v552_v31 = vpop.f32.mrb[4].mxu1 }
 0x45b   :  { %v556_v32 = vadd.f32 %v552_v31, %v146_v30  ;;  %v1280_v33 = vpop.f32.mrb[5].mxu1 }
 0x45d   :  { %v557_v35 = vmax.f32 %v556_v32, 0.0 }
 0x45f   :  { %1314 = vmatmul.mubr.f32.vlgmr.msra.gmra.mrb[12].mxu0 %v557_v35 }
 0x460   :  { %1623 = vmatpush3.bf16.msra.mxu0 %v1741_v9  ;;  %1383 = vmatprep.mubr.msk.f32.mxu0 %vm1673_vm0, %v1674_v4  ;;  %v151_v9 = vadd.f32 %v1923_v7, %v1918_v59  ;;  %v884_v7 = vld [vmem:[%s2105_s6] ss:$0 sm:$0xff] }
 0x461   :  { %1624 = vmatprep.subr.bf16.mxu0 %v1672_v2 }
 0x464   :  { %1626 = vmatpush3.bf16.msra.mxu0 %v1756_v15 }
 0x465   :  { %1627 = vmatprep.subr.bf16.mxu0 %v1672_v2 }
 0x468   :  { %1629 = vmatpush3.bf16.msra.mxu0 %v1772_v21 }
 0x469   :  { %1630 = vmatprep.subr.bf16.mxu0 %v1672_v2 }
 0x46c   :  { %1632 = vmatpush3.bf16.msra.mxu0 %v1791_v28 }
 0x46d   :  { %1633 = vmatprep.subr.bf16.mxu0 %v1672_v2 }
 0x470   :  { %1635 = vmatpush3.bf16.msra.mxu0 %v1807_v34  ;;  %v781_v34 = vld [vmem:[%s2103_s5] sm:$0xff] }
 0x471   :  { %1636 = vmatprep.subr.bf16.mxu0 %v1672_v2  ;;  %v1646_v39 = vpack.c.bf16 %v782_v37, %v781_v34 }
 0x474   :  { %1638 = vmatpush3.bf16.msra.mxu0 %v1823_v40  ;;  %v784_v40 = vld [vmem:[%s2103_s5 + $0x18] sm:$0xff] }
 0x475   :  { %1639 = vmatprep.subr.bf16.mxu0 %v1672_v2  ;;  %v1649_v41 = vpack.c.bf16 %v784_v40, %v783_v38 }
 0x478   :  { %1641 = vmatpush3.bf16.msra.mxu0 %v1839_v46  ;;  %v1655_v46 = vpack.c.bf16 %v788_v45, %v787_v44 }
 0x479   :  { %1642 = vmatprep.subr.bf16.mxu0 %v1672_v2 }
 0x47c   :  { %1644 = vmatpush3.bf16.msra.mxu0 %v1849_v50  ;;  %v791_v50 = vld [vmem:[%s2103_s5 + $0x50] sm:$0xff] }
 0x47d   :  { %v1661_v52 = vpack.c.bf16 %v792_v51, %v791_v50 }
 0x532   :  { %v626_v15 = vpop.f32.mrb[12].mxu0 }
 0x533   :  { %v630_v21 = vadd.f32 %v626_v15, %v151_v9  ;;  %v1315_v28 = vpop.f32.mrb[13].mxu0 }
 0x535   :  { %v631_v36 = vmax.f32 %v630_v21, 0.0 }
 0x537   :  { %1349 = vmatmul.mubr.f32.vlgmr.msra.gmra.mrb[6].mxu1 %v631_v36 }
 0x538   :  { %1418 = vmatprep.mubr.msk.f32.mxu1 %vm1673_vm0, %v1674_v4  ;;  %1647 = vmatpush3.bf16.msra.mxu1 %v1646_v39  ;;  %v785_v4 = vld [vmem:[%s2103_s5 + $0x20] sm:$0xff] }
 0x539   :  { %1648 = vmatprep.subr.bf16.mxu1 %v1672_v2  ;;  %v1652_v43 = vpack.c.bf16 %v786_v42, %v785_v4 }
 0x53c   :  { %1650 = vmatpush3.bf16.msra.mxu1 %v1649_v41 }
 0x53d   :  { %1651 = vmatprep.subr.bf16.mxu1 %v1672_v2 }
 0x540   :  { %1653 = vmatpush3.bf16.msra.mxu1 %v1652_v43 }
 0x541   :  { %1654 = vmatprep.subr.bf16.mxu1 %v1672_v2 }
 0x544   :  { %1656 = vmatpush3.bf16.msra.mxu1 %v1655_v46 }
 0x545   :  { %1657 = vmatprep.subr.bf16.mxu1 %v1672_v2 }
 0x548   :  { %1659 = vmatpush3.bf16.msra.mxu1 %v1658_v49 }
 0x549   :  { %1660 = vmatprep.subr.bf16.mxu1 %v1672_v2 }
 0x54c   :  { %1662 = vmatpush3.bf16.msra.mxu1 %v1661_v52 }
 0x54d   :  { %1663 = vmatprep.subr.bf16.mxu1 %v1672_v2 }
 0x550   :  { %1665 = vmatpush3.bf16.msra.mxu1 %v1664_v55 }
 0x551   :  { %1666 = vmatprep.subr.bf16.mxu1 %v1672_v2  ;;  %v161_v2 = vadd.f32 %v1945_v10, %v1918_v59 }
 0x554   :  { %1668 = vmatpush3.bf16.msra.mxu1 %v1667_v0 }
 0x60a   :  { %v700_v57 = vpop.f32.mrb[6].mxu1 }
 0x60b   :  { %v704_v58 = vadd.f32 %v700_v57, %v156_v56  ;;  %v1350_v60 = vpop.f32.mrb[7].mxu1 }
 0x60d   :  { %v705_v61 = vmax.f32 %v704_v58, 0.0 }
 0x60f   :  { %1384 = vmatmul.mubr.f32.vlgmr.msra.gmra.mrb[14].mxu0 %v705_v61 }
 0x6e2   :  { %v774_v1 = vpop.f32.mrb[14].mxu0 }
 0x6e3   :  { %v778_v3 = vadd.f32 %v774_v1, %v161_v2  ;;  %v1385_v5 = vpop.f32.mrb[15].mxu0 }
 0x6e5   :  { %v779_v6 = vmax.f32 %v778_v3, 0.0 }
 0x6e7   :  { %780 = vst [vmem:[%s2104_s8] sm:$0xff] %v779_v6  ;;  %1419 = vmatmul.mubr.f32.vlgmr.msra.gmra.mrb[8].mxu1 %v779_v6 }
 0x7ba   :  { %v870_v8 = vpop.f32.mrb[8].mxu1 }
 0x7bb   :  { %v871_v11 = vadd.f32 %v884_v7, %v870_v8  ;;  %v1420_v12 = vpop.f32.mrb[9].mxu1 }
 0x7bd   :  { %874 = vst [vmem:[%s2106_s7] sm:$0xff] %v871_v11 }

</bundles_post_ra>
